<compile_context>
chip_gen: v6e
topology: v6e:2x2x1
jax: 0.10.0
libtpu: 0.0.40
codegen_flags: <defaults>
</compile_context>

<pallas_src>
import functools

import jax
import jax.numpy as jnp
from jax.experimental import pallas as pl
from jax.experimental.pallas import tpu as pltpu

LANE = 128  # TPU vreg lane width


def _round_up(n, m):
    return (n + m - 1) // m * m


def rl_agent_kernel(x_ref, w1_ref, w2_ref, o_ref):
    # x_ref: (BT, D_pad)  w1_ref: (D_pad, H_pad)  w2_ref: (H_pad, A_pad)
    # Biases are already folded into the weights via the constant-1 channel.
    h = jnp.dot(x_ref[...], w1_ref[...], preferred_element_type=jnp.float32)  # MXU
    h = jnp.maximum(h, 0.0)                                                   # VPU ReLU
    o = jnp.dot(h, w2_ref[...], preferred_element_type=jnp.float32)           # MXU
    o_ref[...] = o.astype(o_ref.dtype)


def pack_params(w1, b1, w2, b2):
    """Pack (w1, b1, w2, b2) into two lane-padded augmented weight matrices.

    Layout (all zero-padded to multiples of 128):
      W1p[:D, :H]   = w1        W1p[D, :H] = b1       W1p[D, H] = 1.0
      W2p[:H, :A]   = w2        W2p[H, :A] = b2
    With x_pad[:, D] == 1, the kernel's two plain matmuls reproduce
    relu(x @ w1 + b1) @ w2 + b2 exactly (padded rows/cols contribute 0).
    """
    input_dim, hidden = w1.shape
    action_dim = w2.shape[1]
    d_pad = _round_up(input_dim + 1, LANE)   # +1 for the constant-1 column
    h_pad = _round_up(hidden + 1, LANE)      # +1 for the constant-1 hidden channel
    a_pad = _round_up(action_dim, LANE)

    w1p = jnp.zeros((d_pad, h_pad), jnp.float32)
    w1p = w1p.at[:input_dim, :hidden].set(w1.astype(jnp.float32))
    w1p = w1p.at[input_dim, :hidden].set(b1.reshape(-1).astype(jnp.float32))
    w1p = w1p.at[input_dim, hidden].set(1.0)  # h[:, hidden] == 1 -> carries layer-2 bias

    w2p = jnp.zeros((h_pad, a_pad), jnp.float32)
    w2p = w2p.at[:hidden, :action_dim].set(w2.astype(jnp.float32))
    w2p = w2p.at[hidden, :action_dim].set(b2.reshape(-1).astype(jnp.float32))
    return w1p, w2p


@functools.partial(jax.jit, static_argnames=("input_dim", "action_dim", "block_b"))
def rl_agent_forward(x, w1p, w2p, *, input_dim, action_dim, block_b=512):
    """x: (B, input_dim) f32; w1p/w2p: packed padded weights from pack_params."""
    B = x.shape[0]
    d_pad, h_pad = w1p.shape
    a_pad = w2p.shape[1]

    # Batch tile: up to 512 rows per grid step; tiny batches collapse to one step.
    bb = min(block_b, _round_up(B, 8))
    b_pad = _round_up(B, bb)

    # Pad batch + features, and set the constant-1 column that folds the biases in.
    x_pad = jnp.zeros((b_pad, d_pad), jnp.float32)
    x_pad = x_pad.at[:B, :input_dim].set(x.astype(jnp.float32))
    x_pad = x_pad.at[:, input_dim].set(1.0)

    out_padded = pl.pallas_call(
        rl_agent_kernel,
        out_shape=jax.ShapeDtypeStruct((b_pad, a_pad), jnp.float32),
        grid=(b_pad // bb,),
        in_specs=[
            pl.BlockSpec((bb, d_pad), lambda i: (i, 0)),      # activations: tiled over batch
            pl.BlockSpec((d_pad, h_pad), lambda i: (0, 0)),   # W1': grid-invariant (DMA'd once)
            pl.BlockSpec((h_pad, a_pad), lambda i: (0, 0)),   # W2': grid-invariant (DMA'd once)
        ],
        out_specs=pl.BlockSpec((bb, a_pad), lambda i: (i, 0)),  # lane-dense (A padded to 128)
        compiler_params=pltpu.CompilerParams(
            dimension_semantics=("parallel",),  # batch axis is independent -> megacore on v7x
        ),
    )(x_pad, w1p, w2p)

    return out_padded[:B, :action_dim]


def init_params(key, input_dim, hidden_dim, action_dim):
    # Deterministic synthetic init (shapes match the nn.Linear layers in the module).
    k1, k2, k3, k4 = jax.random.split(key, 4)
    s1 = 1.0 / jnp.sqrt(input_dim)
    s2 = 1.0 / jnp.sqrt(hidden_dim)
    w1 = jax.random.uniform(k1, (input_dim, hidden_dim), jnp.float32, -s1, s1)
    b1 = jax.random.uniform(k2, (1, hidden_dim), jnp.float32, -s1, s1)
    w2 = jax.random.uniform(k3, (hidden_dim, action_dim), jnp.float32, -s2, s2)
    b2 = jax.random.uniform(k4, (1, action_dim), jnp.float32, -s2, s2)
    return w1, b1, w2, b2


if __name__ == "__main__":
    key = jax.random.PRNGKey(0)
    kx, kp = jax.random.split(key)

    batch = 8
    input_dim = 32
    hidden_dim = 64
    action_dim = 8

    x = jax.random.normal(kx, (batch, input_dim), jnp.float32)
    w1, b1, w2, b2 = init_params(kp, input_dim, hidden_dim, action_dim)
    w1p, w2p = pack_params(w1, b1, w2, b2)

    # Small single-tile case (matches the module's typical per-step inference).
    out = rl_agent_forward(x, w1p, w2p, input_dim=input_dim, action_dim=action_dim)
    out = jax.block_until_ready(out)
    ref = jnp.maximum(x @ w1 + b1, 0.0) @ w2 + b2
    assert out.shape == (batch, action_dim)
    assert jnp.allclose(out, ref, atol=1e-4, rtol=1e-5)

    # Larger batch exercising the multi-step batched grid path (3 grid steps of 512).
    xb = jax.random.normal(jax.random.PRNGKey(1), (1536, input_dim), jnp.float32)
    outb = rl_agent_forward(xb, w1p, w2p, input_dim=input_dim, action_dim=action_dim)
    outb = jax.block_until_ready(outb)
    refb = jnp.maximum(xb @ w1 + b1, 0.0) @ w2 + b2
    assert outb.shape == (1536, action_dim)
    assert jnp.allclose(outb, refb, atol=1e-4, rtol=1e-5)

    print("KERNEL_OK")
</pallas_src>

<mosaic_0001>
module attributes {stable_mosaic.version = 11 : i64} {
  func.func @rl_agent_kernel(%arg0: i32, %arg1: memref<8x128xf32, #tpu.memory_space<vmem>>, %arg2: memref<128x128xf32, #tpu.memory_space<vmem>>, %arg3: memref<128x128xf32, #tpu.memory_space<vmem>>, %arg4: memref<8x128xf32, #tpu.memory_space<vmem>>) attributes {dimension_semantics = [#tpu.dimension_semantics<parallel>], iteration_bounds = array<i64: 1>, scalar_prefetch = 0 : i64, scratch_operands = 0 : i64, tpu.core_type = #tpu.core_type<tc>, window_params = [{transform_indices = @transform_0, window_bounds = array<i64: 8, 128>}, {pipeline_mode = #tpu.pipeline_mode<synchronous>, transform_indices = @transform_1, window_bounds = array<i64: 128, 128>}, {pipeline_mode = #tpu.pipeline_mode<synchronous>, transform_indices = @transform_2, window_bounds = array<i64: 128, 128>}, {transform_indices = @transform_3, window_bounds = array<i64: 8, 128>}]} {
    %c0 = arith.constant 0 : index
    %c0_0 = arith.constant 0 : index
    %0 = vector.load %arg1[%c0, %c0_0] : memref<8x128xf32, #tpu.memory_space<vmem>>, vector<8x128xf32>
    %c0_1 = arith.constant 0 : index
    %c0_2 = arith.constant 0 : index
    %1 = vector.load %arg2[%c0_1, %c0_2] : memref<128x128xf32, #tpu.memory_space<vmem>>, vector<128x128xf32>
    %cst = arith.constant dense<0.000000e+00> : vector<8x128xf32>
    %2 = tpu.matmul %0, %1, %cst {dimension_numbers = #tpu.dot_dimension_numbers<[1], [0], [0], [1], [0, 0, 1, 1], [], []>} : vector<8x128xf32>, vector<128x128xf32>, vector<8x128xf32> -> vector<8x128xf32>
    %cst_3 = arith.constant 0.000000e+00 : f32
    %3 = vector.broadcast %cst_3 : f32 to vector<8x128xf32>
    %4 = arith.maximumf %2, %3 : vector<8x128xf32>
    %c0_4 = arith.constant 0 : index
    %c0_5 = arith.constant 0 : index
    %5 = vector.load %arg3[%c0_4, %c0_5] : memref<128x128xf32, #tpu.memory_space<vmem>>, vector<128x128xf32>
    %cst_6 = arith.constant dense<0.000000e+00> : vector<8x128xf32>
    %6 = tpu.matmul %4, %5, %cst_6 {dimension_numbers = #tpu.dot_dimension_numbers<[1], [0], [0], [1], [0, 0, 1, 1], [], []>} : vector<8x128xf32>, vector<128x128xf32>, vector<8x128xf32> -> vector<8x128xf32>
    %c0_7 = arith.constant 0 : index
    %c0_8 = arith.constant 0 : index
    %7 = vector.load %arg4[%c0_7, %c0_8] : memref<8x128xf32, #tpu.memory_space<vmem>>, vector<8x128xf32>
    tpu.vector_store %arg4[%c0_7, %c0_8], %6 {strides = array<i32>} : memref<8x128xf32, #tpu.memory_space<vmem>>, vector<8x128xf32>,
    return
  }
  func.func @transform_0(%arg0: i32) -> (i32, i32) {
    %c0_i32 = arith.constant 0 : i32
    %c0_i32_0 = arith.constant 0 : i32
    return %arg0, %c0_i32 : i32, i32
  }
  func.func @transform_1(%arg0: i32) -> (i32, i32) {
    %c0_i32 = arith.constant 0 : i32
    %c0_i32_0 = arith.constant 0 : i32
    %c0_i32_1 = arith.constant 0 : i32
    return %c0_i32, %c0_i32_0 : i32, i32
  }
  func.func @transform_2(%arg0: i32) -> (i32, i32) {
    %c0_i32 = arith.constant 0 : i32
    %c0_i32_0 = arith.constant 0 : i32
    %c0_i32_1 = arith.constant 0 : i32
    return %c0_i32, %c0_i32_0 : i32, i32
  }
  func.func @transform_3(%arg0: i32) -> (i32, i32) {
    %c0_i32 = arith.constant 0 : i32
    %c0_i32_0 = arith.constant 0 : i32
    return %arg0, %c0_i32 : i32, i32
  }
}

</mosaic_0001>

<bundles_post_ra>
// kernel: rl_agent_forward.1
= control target key start
LH: loop header
LB: loop body
LE: loop exit
PB: predicated region body
PF: predicated region fallthrough
CT: control target
= control target key end

     0   :  { %8 = vsyncpa [#allocation3], 0  ;;  %s484_s0 = inlined_call_operand.vmem [shape: f32[8,128], index: 0, kind: input, shape index: {}]   ;;  %s485_s1 = inlined_call_operand.hbm [shape: f32[128,128], index: 1, kind: input, shape index: {}]   ;;  %s486_s2 = inlined_call_operand.hbm [shape: f32[128,128], index: 2, kind: input, shape index: {}]   ;;  %s487_s3 = inlined_call_operand.hbm [shape: f32[8,128], index: 3, kind: output, shape index: {}]  }
   0x1   :  { %9 = vsyncpa [#allocation6], 0 }
   0x2   :  { %10 = vsyncpa [#allocation4], 0  ;;  %s411_s12 = smov [#allocation2]  }
   0x3   :  { %s18_s13 = sshll.u32 %s411_s12, 4  ;;  %s19_s13 = int_to_ptr.vmem [resolvable:$true] %s18_s13 }
   0x4   :  { %s353_s14 = scalar_lea.vmem %s19_s13, 2048  ;;  %p358_p1 = scmp.lt.s32.totalorder %s19_s13, %s19_s13 }
   0x5   :  { %p354_p0 = scmp.ne.s32.totalorder %s19_s13, %s353_s14  ;;  %p359_p2 = scmp.lt.s32.totalorder %s353_s14, %s353_s14 }
   0x7   :  { %p360_p3 = por %p359_p2, %p358_p1 }
   0x9   :  { %p361_p4 = pnand %p360_p3, %p354_p0 }
   0xb   :  { %364 = shalt.err (!%p361_p4)
}
   0xc   :  { %s412_s15 = smov 128   ;;  %s413_s16 = smov 8  }
   0xd   :  { %24 = dma.hbm_to_vmem [thread:$0]  %s485_s1, 2048, %s19_s13, [#allocation3], %s412_s15, %s412_s15, %s413_s16  }
   0xe   :  { %s414_s19 = smov [#allocation5]  }
   0xf   :  { %s30_s20 = sshll.u32 %s414_s19, 4  ;;  %s31_s20 = int_to_ptr.vmem [resolvable:$true] %s30_s20 }
  0x10   :  { %s373_s21 = scalar_lea.vmem %s31_s20, 2048  ;;  %p378_p6 = scmp.lt.s32.totalorder %s31_s20, %s31_s20 }
  0x11   :  { %p374_p5 = scmp.ne.s32.totalorder %s31_s20, %s373_s21  ;;  %p379_p7 = scmp.lt.s32.totalorder %s373_s21, %s373_s21 }
  0x13   :  { %p380_p8 = por %p379_p7, %p378_p6 }
  0x15   :  { %p381_p9 = pnand %p380_p8, %p374_p5 }
  0x17   :  { %384 = shalt.err (!%p381_p9)
}
  0x18   :  { %36 = dma.hbm_to_vmem [thread:$0]  %s486_s2, 2048, %s31_s20, [#allocation6], %s412_s15, %s412_s15, %s413_s16  }
  0x19   :  { %405 = dma.done.wait [#allocation3], 2048  }
  0x1a   :  { %406 = vsyncadd [#allocation3], 4294965248 }
  0x1b   :  { %407 = dma.done.wait [#allocation6], 2048  }
  0x1c   :  { %408 = vsyncadd [#allocation6], 4294965248  ;;  %v415_v0 = vmov 0.0   ;;  %vm416_vm0 = vmmov 0   ;;  %v59_v1 = vld [vmem:[#allocation2 + $0x78] sm:$0xff]  ;;  %v58_v2 = vld [vmem:[#allocation2 + $0x70] sm:$0xff] }
  0x1d   :  { %268 = vmatprep.subr.mxu0 %v415_v0  ;;  %300 = vmatprep.mubr.msk.f32.mxu0 %vm416_vm0, %v415_v0  ;;  %v57_v3 = vld [vmem:[#allocation2 + $0x68] sm:$0xff]  ;;  %v56_v4 = vld [vmem:[#allocation2 + $0x60] sm:$0xff]  ;;  %v146_v5 = vld [vmem:[#allocation5 + $0x78] sm:$0xff] }
  0x1e   :  { %303 = vmatprep.subr.mxu1 %v415_v0  ;;  %335 = vmatprep.mubr.msk.f32.mxu1 %vm416_vm0, %v415_v0  ;;  %v55_v6 = vld [vmem:[#allocation2 + $0x58] sm:$0xff]  ;;  %v145_v7 = vld [vmem:[#allocation5 + $0x70] sm:$0xff]  ;;  %v144_v8 = vld [vmem:[#allocation5 + $0x68] sm:$0xff] }
  0x1f   :  { %269 = vmatpush3.msra.mxu0 %v59_v1  ;;  %304 = vmatpush3.msra.mxu1 %v146_v5  ;;  %v54_v9 = vld [vmem:[#allocation2 + $0x50] sm:$0xff]  ;;  %v143_v10 = vld [vmem:[#allocation5 + $0x60] sm:$0xff]  ;;  %v53_v11 = vld [vmem:[#allocation2 + $0x48] sm:$0xff] }
  0x20   :  { %270 = vmatprep.subr.mxu0 %v415_v0  ;;  %305 = vmatprep.subr.mxu1 %v415_v0  ;;  %v142_v12 = vld [vmem:[#allocation5 + $0x58] sm:$0xff]  ;;  %v52_v13 = vld [vmem:[#allocation2 + $0x40] sm:$0xff]  ;;  %v141_v14 = vld [vmem:[#allocation5 + $0x50] sm:$0xff] }
  0x21   :  { %271 = vmatpush3.msra.mxu0 %v58_v2  ;;  %306 = vmatpush3.msra.mxu1 %v145_v7  ;;  %v51_v15 = vld [vmem:[#allocation2 + $0x38] sm:$0xff]  ;;  %v140_v16 = vld [vmem:[#allocation5 + $0x48] sm:$0xff]  ;;  %v50_v17 = vld [vmem:[#allocation2 + $0x30] sm:$0xff] }
  0x22   :  { %272 = vmatprep.subr.mxu0 %v415_v0  ;;  %307 = vmatprep.subr.mxu1 %v415_v0  ;;  %v139_v18 = vld [vmem:[#allocation5 + $0x40] sm:$0xff]  ;;  %v49_v19 = vld [vmem:[#allocation2 + $0x28] sm:$0xff]  ;;  %v138_v20 = vld [vmem:[#allocation5 + $0x38] sm:$0xff] }
  0x23   :  { %273 = vmatpush3.msra.mxu0 %v57_v3  ;;  %308 = vmatpush3.msra.mxu1 %v144_v8  ;;  %v48_v21 = vld [vmem:[#allocation2 + $0x20] sm:$0xff]  ;;  %v137_v22 = vld [vmem:[#allocation5 + $0x30] sm:$0xff]  ;;  %v47_v23 = vld [vmem:[#allocation2 + $0x18] sm:$0xff] }
  0x24   :  { %274 = vmatprep.subr.mxu0 %v415_v0  ;;  %309 = vmatprep.subr.mxu1 %v415_v0  ;;  %v136_v24 = vld [vmem:[#allocation5 + $0x28] sm:$0xff]  ;;  %v46_v25 = vld [vmem:[#allocation2 + $0x10] sm:$0xff]  ;;  %v135_v26 = vld [vmem:[#allocation5 + $0x20] sm:$0xff] }
  0x25   :  { %275 = vmatpush3.msra.mxu0 %v56_v4  ;;  %310 = vmatpush3.msra.mxu1 %v143_v10  ;;  %v45_v27 = vld [vmem:[#allocation2 + $0x8] sm:$0xff]  ;;  %v134_v28 = vld [vmem:[#allocation5 + $0x18] sm:$0xff]  ;;  %v44_v29 = vld [vmem:[#allocation2] sm:$0xff] }
  0x26   :  { %276 = vmatprep.subr.mxu0 %v415_v0  ;;  %311 = vmatprep.subr.mxu1 %v415_v0  ;;  %v43_v30 = vld [vmem:[%s484_s0] sm:$0xff]  ;;  %v133_v31 = vld [vmem:[#allocation5 + $0x10] sm:$0xff]  ;;  %v132_v32 = vld [vmem:[#allocation5 + $0x8] sm:$0xff]  ;;  %s417_s0 = smov [#allocation7]  }
  0x27   :  { %277 = vmatpush3.msra.mxu0 %v55_v6  ;;  %312 = vmatpush3.msra.mxu1 %v142_v12  ;;  %v131_v33 = vld [vmem:[#allocation5] sm:$0xff]  ;;  %s224_s24 = sshll.u32 %s417_s0, 4  ;;  %s225_s24 = int_to_ptr.vmem [resolvable:$true] %s224_s24 }
  0x28   :  { %278 = vmatprep.subr.mxu0 %v415_v0  ;;  %313 = vmatprep.subr.mxu1 %v415_v0  ;;  %s385_s25 = scalar_lea.vmem %s225_s24, 128  ;;  %p390_p11 = scmp.lt.s32.totalorder %s225_s24, %s225_s24 }
  0x29   :  { %279 = vmatpush3.msra.mxu0 %v54_v9  ;;  %314 = vmatpush3.msra.mxu1 %v141_v14  ;;  %p386_p10 = scmp.ne.s32.totalorder %s225_s24, %s385_s25  ;;  %p391_p12 = scmp.lt.s32.totalorder %s385_s25, %s385_s25 }
  0x2a   :  { %280 = vmatprep.subr.mxu0 %v415_v0  ;;  %315 = vmatprep.subr.mxu1 %v415_v0 }
  0x2b   :  { %281 = vmatpush3.msra.mxu0 %v53_v11  ;;  %316 = vmatpush3.msra.mxu1 %v140_v16  ;;  %p392_p13 = por %p391_p12, %p390_p11 }
  0x2c   :  { %282 = vmatprep.subr.mxu0 %v415_v0  ;;  %317 = vmatprep.subr.mxu1 %v415_v0 }
  0x2d   :  { %283 = vmatpush3.msra.mxu0 %v52_v13  ;;  %318 = vmatpush3.msra.mxu1 %v139_v18  ;;  %p393_p0 = pnand %p392_p13, %p386_p10 }
  0x2e   :  { %284 = vmatprep.subr.mxu0 %v415_v0  ;;  %319 = vmatprep.subr.mxu1 %v415_v0 }
  0x2f   :  { %285 = vmatpush3.msra.mxu0 %v51_v15  ;;  %320 = vmatpush3.msra.mxu1 %v138_v20 }
  0x30   :  { %286 = vmatprep.subr.mxu0 %v415_v0  ;;  %321 = vmatprep.subr.mxu1 %v415_v0 }
  0x31   :  { %287 = vmatpush3.msra.mxu0 %v50_v17  ;;  %322 = vmatpush3.msra.mxu1 %v137_v22 }
  0x32   :  { %288 = vmatprep.subr.mxu0 %v415_v0  ;;  %323 = vmatprep.subr.mxu1 %v415_v0 }
  0x33   :  { %289 = vmatpush3.msra.mxu0 %v49_v19  ;;  %324 = vmatpush3.msra.mxu1 %v136_v24 }
  0x34   :  { %290 = vmatprep.subr.mxu0 %v415_v0  ;;  %325 = vmatprep.subr.mxu1 %v415_v0 }
  0x35   :  { %291 = vmatpush3.msra.mxu0 %v48_v21  ;;  %326 = vmatpush3.msra.mxu1 %v135_v26 }
  0x36   :  { %292 = vmatprep.subr.mxu0 %v415_v0  ;;  %327 = vmatprep.subr.mxu1 %v415_v0 }
  0x37   :  { %293 = vmatpush3.msra.mxu0 %v47_v23  ;;  %328 = vmatpush3.msra.mxu1 %v134_v28 }
  0x38   :  { %294 = vmatprep.subr.mxu0 %v415_v0  ;;  %329 = vmatprep.subr.mxu1 %v415_v0 }
  0x39   :  { %295 = vmatpush3.msra.mxu0 %v46_v25  ;;  %330 = vmatpush3.msra.mxu1 %v133_v31 }
  0x3a   :  { %296 = vmatprep.subr.mxu0 %v415_v0  ;;  %331 = vmatprep.subr.mxu1 %v415_v0 }
  0x3b   :  { %297 = vmatpush3.msra.mxu0 %v45_v27  ;;  %332 = vmatpush3.msra.mxu1 %v132_v32 }
  0x3c   :  { %298 = vmatprep.subr.mxu0 %v415_v0  ;;  %333 = vmatprep.subr.mxu1 %v415_v0 }
  0x3d   :  { %299 = vmatpush3.msra.mxu0 %v44_v29  ;;  %334 = vmatpush3.msra.mxu1 %v131_v33 }
  0x3e   :  { %301 = vmatmul.mubr.f32.vlgmr.msra.gmra.mxu0 %v43_v30 }
  0xfe   :  { %v126_v34 = vpop.f32.mrf.mxu0 }
  0xff   :  { %v130_v35 = vmax.f32 %v126_v34, 0.0 }
 0x100   :  { %v302_v36 = vpop.f32.mrf.mxu0 }
 0x101   :  { %336 = vmatmul.mubr.f32.vlgmr.msra.gmra.mxu1 %v130_v35 }
 0x1c1   :  { %v213_v37 = vpop.f32.mrf.mxu1 }
 0x1c2   :  { %217 = vst [vmem:[#allocation7] sm:$0xff] %v213_v37 }
 0x1c3   :  { %v337_v38 = vpop.f32.mrf.mxu1 }
 0x1c4   :  { %396 = shalt.err (!%p393_p0)
}
 0x1c5   :  { %227 = dma.vmem_to_hbm [thread:$0]  %s225_s24, 128, %s487_s3, [#allocation4]  }
 0x1c6   :  { %409 = dma.done.wait [#allocation4], 128  }
 0x1c7   :  { %410 = vsyncadd [#allocation4], 4294967168 }
 0x1c8   :  { %231 = vsyncpa [#allocation3], 1 }
 0x1c9   :  { %232 = vsyncpa [#allocation6], 1 }
 0x1ca   :  { %233 = vsyncpa [#allocation4], 1 }

</bundles_post_ra>
